<compile_context>
chip_gen: v7x
topology: tpu7x:2x2x1
jax: 0.10.0
libtpu: 0.0.40
codegen_flags: <defaults>
</compile_context>

<pallas_src>
import math
from functools import partial

import numpy as np
import jax
import jax.numpy as jnp
from jax.experimental import pallas as pl
from jax.experimental.pallas import tpu as pltpu


def _round_up(x, m):
    return (x + m - 1) // m * m


def _tpu_budget():
    """Generation-aware block / VMEM / pipelining defaults."""
    vmem_cap = 128 * 1024 * 1024
    try:
        info = pltpu.get_tpu_info()
        vmem_cap = int(getattr(info, "vmem_capacity_bytes", vmem_cap))
    except Exception:
        pass
    if vmem_cap <= 64 * 1024 * 1024:
        # v7x-class: 64 MiB VMEM per TC, double-buffered in+out ~= 4x block.
        # 2 TCs share the ("parallel",) grid -> want >=6 total steps (>=3/TC).
        return dict(block_bytes=6 * 1024 * 1024,
                    vmem_limit_bytes=40 * 1024 * 1024,
                    min_grid_steps=6)
    # v5e / v6e: single TensorCore, 128 MiB VMEM -> larger blocks, >=3 steps
    # so input-DMA / compute / writeback overlap.
    return dict(block_bytes=8 * 1024 * 1024,
                vmem_limit_bytes=64 * 1024 * 1024,
                min_grid_steps=3)


def _hardtanh_bounding_kernel(x_ref, lo_ref, hi_ref, o_ref):
    # lo/hi are (1, lane) per-lane bounds: (min_val, max_val) on bounded
    # channels and (-inf, +inf) elsewhere, so bounded channels get hardtanh
    # and the rest pass through unchanged.  2 VALU ops per vreg, no mask tile.
    x = x_ref[...]
    o_ref[...] = jnp.minimum(jnp.maximum(x, lo_ref[...]), hi_ref[...])


def _clamp_all_kernel(x_ref, o_ref, *, min_val, max_val):
    # All channels bounded -> plain clamp, no per-lane vectors needed.
    o_ref[...] = jnp.clip(x_ref[...], min_val, max_val).astype(o_ref.dtype)


def hardtanh_bounding(x, data_index, min_val, max_val, *,
                      tile_rows=None, block_bytes=None, vmem_limit_bytes=None):
    """Apply HardtanhBounding.forward semantics to x (variables on last axis)."""
    orig_shape = x.shape
    n_vars = orig_shape[-1]

    # Normalize (handles PyTorch-style negative indices) and deduplicate.
    data_index = sorted({int(i) % n_vars for i in data_index})
    if not data_index:
        return x                                    # nothing to bound: free

    total = x.size
    rows_orig = total // n_vars
    itemsize = jnp.dtype(x.dtype).itemsize
    sub = 8 * max(1, 4 // itemsize)                 # sublane granularity / dtype

    budget = _tpu_budget()
    if block_bytes is None:
        block_bytes = budget["block_bytes"]
    if vmem_limit_bytes is None:
        vmem_limit_bytes = budget["vmem_limit_bytes"]
    min_steps = budget["min_grid_steps"]

    # --- choose a lane-dense last dim (multiple of 128) when the reshape is free ---
    lane = n_vars
    if n_vars % 128 != 0:
        lcm = n_vars * 128 // math.gcd(n_vars, 128)
        k = lcm // n_vars
        if lcm <= 4096 and rows_orig % k == 0:
            lane = lcm
        # TODO(synk): when rows_orig % k != 0, process the divisible prefix
        # lane-dense plus a small remainder call instead of falling back to a
        # sub-128 lane width (masked vst).
    k = lane // n_vars
    rows = total // lane
    x2 = x.reshape(rows, lane)                      # contiguous reshape, no copy

    # --- tile sizing: big blocks, enough grid steps to pipeline ---
    auto = tile_rows is None
    if auto:
        tile_rows = max(sub, (block_bytes // (lane * itemsize)) // sub * sub)
    else:
        tile_rows = max(sub, _round_up(int(tile_rows), sub))
    tile_rows = min(tile_rows, _round_up(rows, sub))
    if auto and rows >= min_steps * sub:
        tile_rows = min(tile_rows, _round_up(pl.cdiv(rows, min_steps), sub))
    grid = (pl.cdiv(rows, tile_rows),)              # ragged last block: Pallas masks

    x_spec = pl.BlockSpec((tile_rows, lane), lambda i: (i, 0))
    compiler_params = pltpu.CompilerParams(
        dimension_semantics=("parallel",),
        vmem_limit_bytes=vmem_limit_bytes,
    )

    if len(data_index) == n_vars:
        # Every channel bounded: plain clamp kernel.
        out = pl.pallas_call(
            partial(_clamp_all_kernel, min_val=float(min_val), max_val=float(max_val)),
            out_shape=jax.ShapeDtypeStruct((rows, lane), x.dtype),
            grid_spec=pl.GridSpec(grid=grid, in_specs=[x_spec], out_specs=x_spec),
            input_output_aliases={0: 0},
            compiler_params=compiler_params,
        )(x2)
    else:
        # Per-lane clamp bounds built at trace time (numpy), tiny (1, lane) inputs.
        if jnp.issubdtype(x.dtype, jnp.floating):
            neg, pos = -np.inf, np.inf
        else:
            ii = np.iinfo(np.dtype(x.dtype))
            neg, pos = ii.min, ii.max
        lo_np = np.full((1, lane), neg, dtype=np.float64)
        hi_np = np.full((1, lane), pos, dtype=np.float64)
        bounded = np.array([r * n_vars + i for r in range(k) for i in data_index],
                           dtype=np.int64)
        lo_np[0, bounded] = min_val
        hi_np[0, bounded] = max_val
        lo = jnp.asarray(lo_np, dtype=x.dtype)
        hi = jnp.asarray(hi_np, dtype=x.dtype)
        bound_spec = pl.BlockSpec((1, lane), lambda i: (0, 0))  # fetched once

        out = pl.pallas_call(
            _hardtanh_bounding_kernel,
            out_shape=jax.ShapeDtypeStruct((rows, lane), x.dtype),
            grid_spec=pl.GridSpec(
                grid=grid,
                in_specs=[x_spec, bound_spec, bound_spec],
                out_specs=x_spec,
            ),
            input_output_aliases={0: 0},
            compiler_params=compiler_params,
        )(x2, lo, hi)

    return out.reshape(orig_shape)


if __name__ == "__main__":
    # --- deterministic "module __init__" setup (no checkpoint load) ---
    n_vars = 32
    name_to_index = {f"var_{i}": i for i in range(n_vars)}
    # bound a subset of variables (what InputTensorIndex._only would resolve to)
    variables = ["var_1", "var_3", "var_5", "var_10", "var_20", "var_31"]
    data_index = [name_to_index[v] for v in variables]
    min_val, max_val = 0.0, 1.0

    # --- inputs: batch=2, seq=8, n_vars=32 ---
    key = jax.random.PRNGKey(0)
    x = jax.random.normal(key, (2, 8, n_vars), dtype=jnp.float32) * 2.0

    # reference (plain JAX replica of the PyTorch forward), computed first
    idx = jnp.asarray(data_index)
    ref = x.at[..., idx].set(jnp.clip(x[..., idx], min_val, max_val))

    out = hardtanh_bounding(x, data_index, min_val, max_val)
    out = jax.block_until_ready(out)

    assert out.shape == x.shape and out.dtype == x.dtype
    assert jnp.array_equal(out, ref), "mismatch vs reference"
    print("KERNEL_OK")
</pallas_src>

<mosaic_0001>
module attributes {stable_mosaic.version = 11 : i64} {
  func.func @_hardtanh_bounding_kernel(%arg0: i32, %arg1: memref<8x128xf32, #tpu.memory_space<vmem>>, %arg2: memref<1x128xf32, #tpu.memory_space<vmem>>, %arg3: memref<1x128xf32, #tpu.memory_space<vmem>>, %arg4: memref<8x128xf32, #tpu.memory_space<vmem>>) attributes {dimension_semantics = [#tpu.dimension_semantics<parallel>], iteration_bounds = array<i64: 1>, scalar_prefetch = 0 : i64, scratch_operands = 0 : i64, tpu.core_type = #tpu.core_type<tc>, window_params = [{transform_indices = @transform_0, window_bounds = array<i64: 8, 128>}, {pipeline_mode = #tpu.pipeline_mode<synchronous>, transform_indices = @transform_1, window_bounds = array<i64: 1, 128>}, {pipeline_mode = #tpu.pipeline_mode<synchronous>, transform_indices = @transform_2, window_bounds = array<i64: 1, 128>}, {transform_indices = @transform_3, window_bounds = array<i64: 8, 128>}]} {
    %c0 = arith.constant 0 : index
    %c0_0 = arith.constant 0 : index
    %0 = vector.load %arg1[%c0, %c0_0] : memref<8x128xf32, #tpu.memory_space<vmem>>, vector<8x128xf32>
    %c0_1 = arith.constant 0 : index
    %c0_2 = arith.constant 0 : index
    %1 = vector.load %arg2[%c0_1, %c0_2] : memref<1x128xf32, #tpu.memory_space<vmem>>, vector<1x128xf32>
    %2 = vector.broadcast %1 : vector<1x128xf32> to vector<8x128xf32>
    %3 = arith.maximumf %0, %2 : vector<8x128xf32>
    %c0_3 = arith.constant 0 : index
    %c0_4 = arith.constant 0 : index
    %4 = vector.load %arg3[%c0_3, %c0_4] : memref<1x128xf32, #tpu.memory_space<vmem>>, vector<1x128xf32>
    %5 = vector.broadcast %4 : vector<1x128xf32> to vector<8x128xf32>
    %6 = arith.minimumf %3, %5 : vector<8x128xf32>
    %c0_5 = arith.constant 0 : index
    %c0_6 = arith.constant 0 : index
    %7 = vector.load %arg4[%c0_5, %c0_6] : memref<8x128xf32, #tpu.memory_space<vmem>>, vector<8x128xf32>
    tpu.vector_store %arg4[%c0_5, %c0_6], %6 {strides = array<i32>} : memref<8x128xf32, #tpu.memory_space<vmem>>, vector<8x128xf32>,
    return
  }
  func.func @transform_0(%arg0: i32) -> (i32, i32) {
    %c0_i32 = arith.constant 0 : i32
    %c0_i32_0 = arith.constant 0 : i32
    return %arg0, %c0_i32 : i32, i32
  }
  func.func @transform_1(%arg0: i32) -> (i32, i32) {
    %c0_i32 = arith.constant 0 : i32
    %c0_i32_0 = arith.constant 0 : i32
    %c0_i32_1 = arith.constant 0 : i32
    return %c0_i32, %c0_i32_0 : i32, i32
  }
  func.func @transform_2(%arg0: i32) -> (i32, i32) {
    %c0_i32 = arith.constant 0 : i32
    %c0_i32_0 = arith.constant 0 : i32
    %c0_i32_1 = arith.constant 0 : i32
    return %c0_i32, %c0_i32_0 : i32, i32
  }
  func.func @transform_3(%arg0: i32) -> (i32, i32) {
    %c0_i32 = arith.constant 0 : i32
    %c0_i32_0 = arith.constant 0 : i32
    return %arg0, %c0_i32 : i32, i32
  }
}

</mosaic_0001>

<bundles_post_ra>
// kernel: tpu_custom_call.1
= control target key start
LH: loop header
LB: loop body
LE: loop exit
PB: predicated region body
PF: predicated region fallthrough
CT: control target
= control target key end

     0   :  { %8 = vsyncpa [#allocation3], 0  ;;  %s278_s0 = inlined_call_operand.hbm [shape: f32[4,128], index: 0, kind: input, shape index: {}, may-alias: {0,3}]   ;;  %s279_s1 = inlined_call_operand.hbm [shape: f32[1,128], index: 1, kind: input, shape index: {}]   ;;  %s280_s2 = inlined_call_operand.hbm [shape: f32[1,128], index: 2, kind: input, shape index: {}]   ;;  %s281_s3 = inlined_call_operand.hbm [shape: f32[4,128], index: 3, kind: output, shape index: {}, may-alias: {0,3}]  }
   0x1   :  { %9 = vsyncpa [#allocation6], 0 }
   0x2   :  { %10 = vsyncpa [#allocation4], 0 }
   0x3   :  { %15 = vsyncadd [#allocation3], 64  ;;  %s190_s12 = smov [#allocation5]   ;;  %s191_s14 = smov [#allocation2]  }
   0x4   :  { %s29_s13 = sshll.u32 %s190_s12, 4  ;;  %s16_s15 = sshll.u32 %s191_s14, 4  ;;  %s30_s13 = int_to_ptr.vmem [resolvable:$true] %s29_s13  ;;  %s216_s15 = int_to_ptr.vmem [resolvable:$true] %s16_s15 }
   0x5   :  { %s96_s18 = scalar_lea.hbm %s279_s1, 16 }
   0x6   :  { %p97_p0 = scmp.ne.s32.totalorder %s279_s1, %s96_s18  ;;  %p100_p1 = scmp.lt.u32.totalorder %s96_s18, %s279_s1 }
   0x8   :  { %p102_p2 = pnand %p100_p1, %p97_p0 }
   0xa   :  { %105 = shalt.err (!%p102_p2)
}
   0xb   :  { %s106_s23 = scalar_lea.vmem %s30_s13, 16  ;;  %s110_s24 = scalar_lea.vmem %s30_s13, 32 }
   0xc   :  { %p107_p3 = scmp.ne.s32.totalorder %s30_s13, %s106_s23  ;;  %p111_p4 = scmp.lt.s32.totalorder %s30_s13, %s30_s13 }
   0xd   :  { %p112_p5 = scmp.lt.s32.totalorder %s110_s24, %s106_s23 }
   0xf   :  { %p113_p6 = por %p112_p5, %p111_p4 }
  0x11   :  { %p114_p7 = pnand %p113_p6, %p107_p3 }
  0x13   :  { %117 = shalt.err (!%p114_p7)
}
  0x14   :  { %32 = dma.hbm_to_vmem [thread:$0]  %s279_s1, 16, %s30_s13, [#allocation6]  }
  0x15   :  { %s118_s29 = scalar_lea.hbm %s278_s0, 64 }
  0x16   :  { %p119_p8 = scmp.ne.s32.totalorder %s278_s0, %s118_s29  ;;  %p122_p9 = scmp.lt.u32.totalorder %s118_s29, %s278_s0 }
  0x18   :  { %p124_p10 = pnand %p122_p9, %p119_p8 }
  0x1a   :  { %127 = shalt.err (!%p124_p10)
}
  0x1b   :  { %s128_s7 = scalar_lea.vmem %s216_s15, 64  ;;  %s132_s1 = scalar_lea.vmem %s216_s15, 128 }
  0x1c   :  { %p129_p11 = scmp.ne.s32.totalorder %s216_s15, %s128_s7  ;;  %p133_p12 = scmp.lt.s32.totalorder %s216_s15, %s216_s15 }
  0x1d   :  { %p134_p13 = scmp.lt.s32.totalorder %s132_s1, %s128_s7 }
  0x1f   :  { %p135_p0 = por %p134_p13, %p133_p12 }
  0x21   :  { %p136_p1 = pnand %p135_p0, %p129_p11 }
  0x23   :  { %139 = shalt.err (!%p136_p1)
}
  0x24   :  { %s192_s8 = smov 64   ;;  %s193_s9 = smov 4  }
  0x25   :  { %22 = dma.hbm_to_vmem [thread:$0]  %s278_s0, 64, %s216_s15, [#allocation3], %s192_s8, %s192_s8, %s193_s9  }
  0x26   :  { %s194_s12 = smov [#allocation7]   ;;  %s140_s17 = scalar_lea.hbm %s280_s2, 16 }
  0x27   :  { %s39_s13 = sshll.u32 %s194_s12, 4  ;;  %p141_p2 = scmp.ne.s32.totalorder %s280_s2, %s140_s17  ;;  %s40_s13 = int_to_ptr.vmem [resolvable:$true] %s39_s13 }
  0x28   :  { %p144_p3 = scmp.lt.u32.totalorder %s140_s17, %s280_s2 }
  0x2a   :  { %p146_p4 = pnand %p144_p3, %p141_p2 }
  0x2c   :  { %149 = shalt.err (!%p146_p4)
}
  0x2d   :  { %s150_s22 = scalar_lea.vmem %s40_s13, 16  ;;  %s154_s0 = scalar_lea.vmem %s40_s13, 32 }
  0x2e   :  { %p151_p5 = scmp.ne.s32.totalorder %s40_s13, %s150_s22  ;;  %p155_p6 = scmp.lt.s32.totalorder %s40_s13, %s40_s13 }
  0x2f   :  { %p156_p7 = scmp.lt.s32.totalorder %s154_s0, %s150_s22 }
  0x31   :  { %p157_p8 = por %p156_p7, %p155_p6 }
  0x33   :  { %p158_p9 = pnand %p157_p8, %p151_p5 }
  0x35   :  { %161 = shalt.err (!%p158_p9)
}
  0x36   :  { %42 = dma.hbm_to_vmem [thread:$0]  %s280_s2, 16, %s40_s13, [#allocation6]  }
  0x37   :  { %184 = dma.done.wait [#allocation3], 128  }
  0x38   :  { %185 = vsyncadd [#allocation3], 4294967168 }
  0x39   :  { %186 = dma.done.wait [#allocation6], 32  }
  0x3a   :  { %187 = vsyncadd [#allocation6], 4294967264  ;;  %v52_v0 = vld [vmem:[#allocation2] sm:$0xff]  ;;  %v88_v1 = vld [vmem:[#allocation5] ss:$0 sm:$0xff] }
  0x3b   :  { %v89_v2 = vld [vmem:[#allocation7] ss:$0 sm:$0xff]  ;;  %v60_v3 = vmax.f32 %v52_v0, %v88_v1 }
  0x3d   :  { %v68_v4 = vmin.f32 %v60_v3, %v89_v2 }
  0x3f   :  { %69 = vst [vmem:[#allocation8] sm:$0xff] %v68_v4 }
  0x40   :  { %74 = vsyncadd [#allocation4], 64  ;;  %s195_s24 = smov [#allocation8]  }
  0x41   :  { %s75_s25 = sshll.u32 %s195_s24, 4  ;;  %s76_s25 = int_to_ptr.vmem [resolvable:$true] %s75_s25 }
  0x42   :  { %s162_s26 = scalar_lea.vmem %s76_s25, 64  ;;  %s166_s27 = scalar_lea.vmem %s76_s25, 128 }
  0x43   :  { %p163_p10 = scmp.ne.s32.totalorder %s76_s25, %s162_s26  ;;  %p167_p11 = scmp.lt.s32.totalorder %s76_s25, %s76_s25 }
  0x44   :  { %p168_p12 = scmp.lt.s32.totalorder %s166_s27, %s162_s26 }
  0x46   :  { %p169_p13 = por %p168_p12, %p167_p11 }
  0x48   :  { %p170_p0 = pnand %p169_p13, %p163_p10 }
  0x4a   :  { %173 = shalt.err (!%p170_p0)
}
  0x4b   :  { %s174_s29 = scalar_lea.hbm %s281_s3, 64 }
  0x4c   :  { %p175_p1 = scmp.ne.s32.totalorder %s281_s3, %s174_s29  ;;  %p178_p2 = scmp.lt.u32.totalorder %s174_s29, %s281_s3 }
  0x4e   :  { %p180_p3 = pnand %p178_p2, %p175_p1 }
  0x50   :  { %183 = shalt.err (!%p180_p3)
}
  0x51   :  { %81 = dma.vmem_to_hbm [thread:$0]  %s76_s25, 64, %s281_s3, [#allocation4], %s192_s8, %s192_s8, %s193_s9  }
  0x52   :  { %188 = dma.done.wait [#allocation4], 128  }
  0x53   :  { %189 = vsyncadd [#allocation4], 4294967168 }
  0x54   :  { %85 = vsyncpa [#allocation3], 1 }
  0x55   :  { %86 = vsyncpa [#allocation6], 1 }
  0x56   :  { %87 = vsyncpa [#allocation4], 1 }

</bundles_post_ra>
